<compile_context>
chip_gen: v7x
topology: tpu7x:2x2x1
jax: 0.10.0
libtpu: 0.0.40
codegen_flags: <defaults>
</compile_context>

<pallas_src>
import functools

import jax
import jax.numpy as jnp
from jax.experimental import pallas as pl
from jax.experimental.pallas import tpu as pltpu


def _condition_kernel(perm_ref, cond_ref, params_ref, out_ref, *, d_cond, table_off):
    """Fused Linear(condition) + bias + Embedding(permutation_state).

    perm_ref   : SMEM (B,)              int32 permutation ids (pre-clamped)
    cond_ref   : VMEM (B, d_cond)       f32
    params_ref : VMEM (rows_pad, D)     f32 packed params:
                   rows [0 : d_cond]              = Linear weight (K x D)
                   row  [d_cond]                  = Linear bias   (1 x D)
                   rows [table_off : table_off+P] = embedding table
    out_ref    : VMEM (B, D)            f32
    """
    cond = cond_ref[...]                         # (B, K)
    bsz = cond.shape[0]

    # ---- Linear on the VPU: K is tiny, so K broadcast-FMAs beat an MXU pass.
    # Seed with the (1, D) bias row; the first multiply-add broadcasts it to
    # (B, D) — no explicit broadcast_in_dim materialized.
    acc = params_ref[d_cond:d_cond + 1, :]       # (1, D) bias
    for kk in range(d_cond):                     # static unroll, K is small
        acc = acc + cond[:, kk:kk + 1] * params_ref[kk:kk + 1, :]

    # ---- Embedding gather fused with the add + store: one dynamic row read
    # from the packed table per batch element (SMEM scalar id), added to the
    # matching accumulator row and stored. No concatenate of dynamic slices.
    for bi in range(bsz):                        # static unroll over tiny batch
        idx = perm_ref[bi]                       # scalar read from SMEM
        out_ref[bi:bi + 1, :] = (
            acc[bi:bi + 1, :] + params_ref[pl.ds(table_off + idx, 1), :]
        )


@jax.jit
def model_diffusion_condition(condition, perm_ids, w, b, emb_table):
    """Returns (B, 1, d_model): to_condition(condition)[:,None,:] + emb[perm][:,None,:]."""
    B, d_cond = condition.shape
    d_model = w.shape[1]
    num_perm = emb_table.shape[0]

    # Clamp ids: dynamic VMEM row reads have no runtime bounds check.
    perm_ids = jnp.clip(perm_ids.reshape(B).astype(jnp.int32), 0, num_perm - 1)
    # Normalize bias to (1, d_model) regardless of how it was passed.
    b2 = b.reshape(1, d_model).astype(jnp.float32)

    # Pack W / bias / embedding table into ONE operand -> one HBM->VMEM DMA
    # instead of three. Pad rows up to a multiple of 8 (sublane alignment).
    n_rows = d_cond + 1 + num_perm
    n_pad = (-n_rows) % 8
    params = jnp.concatenate(
        [
            w.astype(jnp.float32),
            b2,
            emb_table.astype(jnp.float32),
            jnp.zeros((n_pad, d_model), jnp.float32),
        ],
        axis=0,
    )

    kernel = functools.partial(
        _condition_kernel, d_cond=d_cond, table_off=d_cond + 1
    )

    out = pl.pallas_call(
        kernel,
        out_shape=jax.ShapeDtypeStruct((B, d_model), jnp.float32),
        in_specs=[
            pl.BlockSpec(memory_space=pltpu.MemorySpace.SMEM),  # perm ids (B,) int32
            pl.BlockSpec(memory_space=pltpu.MemorySpace.VMEM),  # condition (B, d_cond)
            pl.BlockSpec(memory_space=pltpu.MemorySpace.VMEM),  # packed params
        ],
        out_specs=pl.BlockSpec(memory_space=pltpu.MemorySpace.VMEM),
    )(perm_ids, condition.astype(jnp.float32), params)

    return out[:, None, :]  # (B, 1, d_model)


if __name__ == "__main__":
    # config: small shapes consistent with the module
    B = 2
    d_condition = 8
    d_model = 32
    num_permutation = 4
    sequence_length = 8  # unused by the implemented (condition-path) compute

    key = jax.random.PRNGKey(0)
    k_cond, k_w, k_b, k_perm = jax.random.split(key, 4)

    # Inputs
    condition = jax.random.normal(k_cond, (B, d_condition), dtype=jnp.float32)
    permutation_state = jax.random.randint(k_perm, (B,), 0, num_permutation)

    # Parameters (deterministic, synthetic)
    w_to_condition = jax.random.normal(k_w, (d_condition, d_model), dtype=jnp.float32) * 0.02
    b_to_condition = jax.random.normal(k_b, (1, d_model), dtype=jnp.float32) * 0.02
    # nn.Embedding weight is initialized to ones / d_model in __init__ (still a
    # trainable parameter, so it is passed to the kernel, not constant-folded).
    emb_table = jnp.ones((num_permutation, d_model), dtype=jnp.float32) / d_model

    out = model_diffusion_condition(
        condition, permutation_state, w_to_condition, b_to_condition, emb_table
    )
    out = jax.block_until_ready(out)

    # Pure-JAX reference check
    ref = (condition @ w_to_condition + b_to_condition)[:, None, :] \
          + emb_table[permutation_state][:, None, :]
    assert out.shape == (B, 1, d_model)
    assert jnp.allclose(out, ref, atol=1e-5, rtol=1e-5)

    print("KERNEL_OK")
</pallas_src>

<mosaic_0001>
module attributes {stable_mosaic.version = 11 : i64} {
  func.func @_condition_kernel(%arg0: memref<2xi32, #tpu.memory_space<smem>>, %arg1: memref<2x8xf32, #tpu.memory_space<vmem>>, %arg2: memref<16x32xf32, #tpu.memory_space<vmem>>, %arg3: memref<2x32xf32, #tpu.memory_space<vmem>>) attributes {dimension_semantics = [], scalar_prefetch = 0 : i64, scratch_operands = 0 : i64, tpu.core_type = #tpu.core_type<tc>} {
    %c0 = arith.constant 0 : index
    %c0_0 = arith.constant 0 : index
    %0 = vector.load %arg1[%c0, %c0_0] : memref<2x8xf32, #tpu.memory_space<vmem>>, vector<2x8xf32>
    %c8 = arith.constant 8 : index
    %c0_1 = arith.constant 0 : index
    %1 = vector.load %arg2[%c8, %c0_1] : memref<16x32xf32, #tpu.memory_space<vmem>>, vector<1x32xf32>
    %2 = vector.extract_strided_slice %0 {offsets = [0, 0], sizes = [2, 1], strides = [1, 1]} : vector<2x8xf32> to vector<2x1xf32>
    %c0_2 = arith.constant 0 : index
    %c0_3 = arith.constant 0 : index
    %3 = vector.load %arg2[%c0_2, %c0_3] : memref<16x32xf32, #tpu.memory_space<vmem>>, vector<1x32xf32>
    %4 = vector.broadcast %2 : vector<2x1xf32> to vector<2x32xf32>
    %5 = vector.broadcast %3 : vector<1x32xf32> to vector<2x32xf32>
    %6 = arith.mulf %4, %5 : vector<2x32xf32>
    %7 = vector.broadcast %1 : vector<1x32xf32> to vector<2x32xf32>
    %8 = arith.addf %7, %6 : vector<2x32xf32>
    %9 = vector.extract_strided_slice %0 {offsets = [0, 1], sizes = [2, 1], strides = [1, 1]} : vector<2x8xf32> to vector<2x1xf32>
    %c1 = arith.constant 1 : index
    %c0_4 = arith.constant 0 : index
    %10 = vector.load %arg2[%c1, %c0_4] : memref<16x32xf32, #tpu.memory_space<vmem>>, vector<1x32xf32>
    %11 = vector.broadcast %9 : vector<2x1xf32> to vector<2x32xf32>
    %12 = vector.broadcast %10 : vector<1x32xf32> to vector<2x32xf32>
    %13 = arith.mulf %11, %12 : vector<2x32xf32>
    %14 = arith.addf %8, %13 : vector<2x32xf32>
    %15 = vector.extract_strided_slice %0 {offsets = [0, 2], sizes = [2, 1], strides = [1, 1]} : vector<2x8xf32> to vector<2x1xf32>
    %c2 = arith.constant 2 : index
    %c0_5 = arith.constant 0 : index
    %16 = vector.load %arg2[%c2, %c0_5] : memref<16x32xf32, #tpu.memory_space<vmem>>, vector<1x32xf32>
    %17 = vector.broadcast %15 : vector<2x1xf32> to vector<2x32xf32>
    %18 = vector.broadcast %16 : vector<1x32xf32> to vector<2x32xf32>
    %19 = arith.mulf %17, %18 : vector<2x32xf32>
    %20 = arith.addf %14, %19 : vector<2x32xf32>
    %21 = vector.extract_strided_slice %0 {offsets = [0, 3], sizes = [2, 1], strides = [1, 1]} : vector<2x8xf32> to vector<2x1xf32>
    %c3 = arith.constant 3 : index
    %c0_6 = arith.constant 0 : index
    %22 = vector.load %arg2[%c3, %c0_6] : memref<16x32xf32, #tpu.memory_space<vmem>>, vector<1x32xf32>
    %23 = vector.broadcast %21 : vector<2x1xf32> to vector<2x32xf32>
    %24 = vector.broadcast %22 : vector<1x32xf32> to vector<2x32xf32>
    %25 = arith.mulf %23, %24 : vector<2x32xf32>
    %26 = arith.addf %20, %25 : vector<2x32xf32>
    %27 = vector.extract_strided_slice %0 {offsets = [0, 4], sizes = [2, 1], strides = [1, 1]} : vector<2x8xf32> to vector<2x1xf32>
    %c4 = arith.constant 4 : index
    %c0_7 = arith.constant 0 : index
    %28 = vector.load %arg2[%c4, %c0_7] : memref<16x32xf32, #tpu.memory_space<vmem>>, vector<1x32xf32>
    %29 = vector.broadcast %27 : vector<2x1xf32> to vector<2x32xf32>
    %30 = vector.broadcast %28 : vector<1x32xf32> to vector<2x32xf32>
    %31 = arith.mulf %29, %30 : vector<2x32xf32>
    %32 = arith.addf %26, %31 : vector<2x32xf32>
    %33 = vector.extract_strided_slice %0 {offsets = [0, 5], sizes = [2, 1], strides = [1, 1]} : vector<2x8xf32> to vector<2x1xf32>
    %c5 = arith.constant 5 : index
    %c0_8 = arith.constant 0 : index
    %34 = vector.load %arg2[%c5, %c0_8] : memref<16x32xf32, #tpu.memory_space<vmem>>, vector<1x32xf32>
    %35 = vector.broadcast %33 : vector<2x1xf32> to vector<2x32xf32>
    %36 = vector.broadcast %34 : vector<1x32xf32> to vector<2x32xf32>
    %37 = arith.mulf %35, %36 : vector<2x32xf32>
    %38 = arith.addf %32, %37 : vector<2x32xf32>
    %39 = vector.extract_strided_slice %0 {offsets = [0, 6], sizes = [2, 1], strides = [1, 1]} : vector<2x8xf32> to vector<2x1xf32>
    %c6 = arith.constant 6 : index
    %c0_9 = arith.constant 0 : index
    %40 = vector.load %arg2[%c6, %c0_9] : memref<16x32xf32, #tpu.memory_space<vmem>>, vector<1x32xf32>
    %41 = vector.broadcast %39 : vector<2x1xf32> to vector<2x32xf32>
    %42 = vector.broadcast %40 : vector<1x32xf32> to vector<2x32xf32>
    %43 = arith.mulf %41, %42 : vector<2x32xf32>
    %44 = arith.addf %38, %43 : vector<2x32xf32>
    %45 = vector.extract_strided_slice %0 {offsets = [0, 7], sizes = [2, 1], strides = [1, 1]} : vector<2x8xf32> to vector<2x1xf32>
    %c7 = arith.constant 7 : index
    %c0_10 = arith.constant 0 : index
    %46 = vector.load %arg2[%c7, %c0_10] : memref<16x32xf32, #tpu.memory_space<vmem>>, vector<1x32xf32>
    %47 = vector.broadcast %45 : vector<2x1xf32> to vector<2x32xf32>
    %48 = vector.broadcast %46 : vector<1x32xf32> to vector<2x32xf32>
    %49 = arith.mulf %47, %48 : vector<2x32xf32>
    %50 = arith.addf %44, %49 : vector<2x32xf32>
    %c0_11 = arith.constant 0 : index
    %51 = memref.load %arg0[%c0_11] : memref<2xi32, #tpu.memory_space<smem>>
    %52 = vector.extract_strided_slice %50 {offsets = [0, 0], sizes = [1, 32], strides = [1, 1]} : vector<2x32xf32> to vector<1x32xf32>
    %c9_i32 = arith.constant 9 : i32
    %53 = arith.addi %c9_i32, %51 : i32
    %54 = arith.index_cast %53 : i32 to index
    %c0_12 = arith.constant 0 : index
    %55 = vector.load %arg2[%54, %c0_12] : memref<16x32xf32, #tpu.memory_space<vmem>>, vector<1x32xf32>
    %56 = arith.addf %52, %55 : vector<1x32xf32>
    %c0_13 = arith.constant 0 : index
    %c0_14 = arith.constant 0 : index
    %57 = vector.load %arg3[%c0_13, %c0_14] : memref<2x32xf32, #tpu.memory_space<vmem>>, vector<1x32xf32>
    tpu.vector_store %arg3[%c0_13, %c0_14], %56 {strides = array<i32>} : memref<2x32xf32, #tpu.memory_space<vmem>>, vector<1x32xf32>,
    %c1_15 = arith.constant 1 : index
    %58 = memref.load %arg0[%c1_15] : memref<2xi32, #tpu.memory_space<smem>>
    %59 = vector.extract_strided_slice %50 {offsets = [1, 0], sizes = [1, 32], strides = [1, 1]} : vector<2x32xf32> to vector<1x32xf32>
    %c9_i32_16 = arith.constant 9 : i32
    %60 = arith.addi %c9_i32_16, %58 : i32
    %61 = arith.index_cast %60 : i32 to index
    %c0_17 = arith.constant 0 : index
    %62 = vector.load %arg2[%61, %c0_17] : memref<16x32xf32, #tpu.memory_space<vmem>>, vector<1x32xf32>
    %63 = arith.addf %59, %62 : vector<1x32xf32>
    %c1_18 = arith.constant 1 : index
    %c0_19 = arith.constant 0 : index
    %64 = vector.load %arg3[%c1_18, %c0_19] : memref<2x32xf32, #tpu.memory_space<vmem>>, vector<1x32xf32>
    tpu.vector_store %arg3[%c1_18, %c0_19], %63 {strides = array<i32>} : memref<2x32xf32, #tpu.memory_space<vmem>>, vector<1x32xf32>,
    return
  }
}

</mosaic_0001>

<bundles_post_ra>
// kernel: model_diffusion_condition.1
= control target key start
LH: loop header
LB: loop body
LE: loop exit
PB: predicated region body
PF: predicated region fallthrough
CT: control target
= control target key end

     0   :  { %8 = vsyncpa [#allocation4], 0  ;;  %s309_s0 = inlined_call_operand.vmem [shape: s32[2], index: 0, kind: input, shape index: {}]   ;;  %s310_s1 = inlined_call_operand.vmem [shape: f32[2,8], index: 1, kind: input, shape index: {}]   ;;  %s311_s2 = inlined_call_operand.vmem [shape: f32[16,32], index: 2, kind: input, shape index: {}]   ;;  %s312_s3 = inlined_call_operand.hbm [shape: f32[2,32], index: 3, kind: output, shape index: {}]  }
   0x1   :  { %9 = vsyncpa [#allocation3], 0  ;;  %s16_s14 = sshll.u32 %s309_s0, 4  ;;  %s17_s14 = int_to_ptr.vmem [resolvable:$true] %s16_s14 }
   0x2   :  { %s190_s15 = scalar_lea.vmem %s17_s14, 16  ;;  %p195_p1 = scmp.lt.s32.totalorder %s17_s14, %s17_s14 }
   0x3   :  { %p191_p0 = scmp.ne.s32.totalorder %s17_s14, %s190_s15  ;;  %p196_p2 = scmp.lt.s32.totalorder %s190_s15, %s190_s15 }
   0x5   :  { %p197_p3 = por %p196_p2, %p195_p1 }
   0x7   :  { %p198_p4 = pnand %p197_p3, %p191_p0 }
   0x9   :  { %201 = shalt.err (!%p198_p4)
}
   0xa   :  { %s228_s16 = smov [#allocation2]  }
   0xb   :  { %19 = dma.vmem_to_smem %s17_s14, 16, %s228_s16, [#allocation4]  }
   0xc   :  { %224 = dma.done.wait [#allocation4], 16  }
   0xd   :  { %225 = vsyncadd [#allocation4], 4294967280 }
   0xe   :  { %27 = sfence }
   0xf   :  { %v28_v0 = vld [vmem:[%s310_s1] sm:$0x3]  ;;  %v229_v1 = vmov 2   ;;  %v230_v2 = vmov 0   ;;  %v231_v3 = vmov 3   ;;  %v232_v4 = vmov 1  }
  0x10   :  { %183 = vset.pattern.permute.xlu1 %v229_v1  ;;  %181 = vset.pattern.permute.xlu0 %v230_v2  ;;  %v233_v5 = vmov 4   ;;  %v234_v6 = vmov 5   ;;  %v235_v7 = vmov 6   ;;  %v236_v8 = vmov 7   ;;  %v159_v9 = vld [vmem:[%s311_s2] ss:$0 sm:$0xff] }
  0x11   :  { %59 = vperm.xlu1 %183, %v28_v0   ;;  %33 = vperm.xlu0 %181, %v28_v0   ;;  %v160_v12 = vld [vmem:[%s311_s2 + $0x8] ss:$0 sm:$0xff]  ;;  %v161_v14 = vld [vmem:[%s311_s2 + $0x1] ss:$0 sm:$0xff]  ;;  %v162_v16 = vld [vmem:[%s311_s2 + $0x2] ss:$0 sm:$0xff] }
  0x12   :  { %v163_v20 = vld [vmem:[%s311_s2 + $0x3] ss:$0 sm:$0xff]  ;;  %s169_s27 = sld [smem:[#allocation2 + $0x1]]  ;;  %v164_v23 = vld [vmem:[%s311_s2 + $0x4] ss:$0 sm:$0xff]  ;;  %s123_s5 = sld [smem:[#allocation2]] }
  0x13   :  { %v165_v27 = vld [vmem:[%s311_s2 + $0x5] ss:$0 sm:$0xff]  ;;  %v166_v33 = vld [vmem:[%s311_s2 + $0x6] ss:$0 sm:$0xff]  ;;  %v167_v37 = vld [vmem:[%s311_s2 + $0x7] ss:$0 sm:$0xff] }
  0x14   :  { %s237_s16 = smov [#allocation5]   ;;  %vm128_vm0 = vcmask 253952   ;;  %vm138_vm1 = vcmask 254977  }
  0x15   :  { %184 = vset.pattern.permute.xlu1 %v231_v3  ;;  %182 = vset.pattern.permute.xlu0 %v232_v4  ;;  %s146_s17 = sshll.u32 %s237_s16, 4  ;;  %s147_s17 = int_to_ptr.vmem [resolvable:$true] %s146_s17 }
  0x16   :  { %70 = vperm.xlu1 %184, %v28_v0   ;;  %48 = vperm.xlu0 %182, %v28_v0   ;;  %s202_s18 = scalar_lea.vmem %s147_s17, 32  ;;  %p207_p6 = scmp.lt.s32.totalorder %s147_s17, %s147_s17 }
  0x17   :  { %p203_p5 = scmp.ne.s32.totalorder %s147_s17, %s202_s18  ;;  %p208_p7 = scmp.lt.s32.totalorder %s202_s18, %s202_s18 }
  0x18   :  { %s157_s10 = scalar_lea.vmem %s311_s2, %s169_s27  ;;  %s155_s15 = scalar_lea.vmem %s311_s2, %s123_s5 }
  0x19   :  { %v170_v38 = vld [vmem:[%s157_s10 + $0x9] sm:$0x1]  ;;  %p209_p8 = por %p208_p7, %p207_p6 }
  0x1a   :  { %185 = vset.pattern.permute.xlu1 %v233_v5  ;;  %186 = vset.pattern.permute.xlu0 %v234_v6  ;;  %v135_v42 = vrot.slane %v170_v38, 7  ;;  %v168_v43 = vld [vmem:[%s155_s15 + $0x9] sm:$0x1] }
  0x1b   :  { %81 = vperm.xlu1 %185, %v28_v0   ;;  %92 = vperm.xlu0 %186, %v28_v0   ;;  %p210_p9 = pnand %p209_p8, %p203_p5 }
  0x1f   :  { %187 = vset.pattern.permute.xlu1 %v235_v7  ;;  %189 = vset.pattern.permute.xlu0 %v236_v8 }
  0x20   :  { %103 = vperm.xlu1 %187, %v28_v0  }
  0x24   :  { %188 = vset.pattern.permute.xlu1 %v236_v8 }
  0x25   :  { %114 = vperm.xlu1 %188, %v28_v0  }
  0x90   :  { %v60_v10 = vpop.permute.xlu1 %59  ;;  %v34_v11 = vpop.permute.xlu0 %33 }
  0x91   :  { %v40_v13 = vmul.f32 %v159_v9, %v34_v11  ;;  %v66_v21 = vmul.f32 %v162_v16, %v60_v10 }
  0x93   :  { %v45_v15 = vadd.f32 %v160_v12, %v40_v13 }
  0x95   :  { %v71_v17 = vpop.permute.xlu1 %70  ;;  %v49_v18 = vpop.permute.xlu0 %48 }
  0x96   :  { %v55_v19 = vmul.f32 %v161_v14, %v49_v18  ;;  %v77_v24 = vmul.f32 %v163_v20, %v71_v17 }
  0x98   :  { %v56_v22 = vadd.f32 %v55_v19, %v45_v15 }
  0x9a   :  { %v67_v25 = vadd.f32 %v66_v21, %v56_v22  ;;  %v82_v26 = vpop.permute.xlu1 %81  ;;  %v93_v28 = vpop.permute.xlu0 %92 }
  0x9b   :  { %v88_v29 = vmul.f32 %v164_v23, %v82_v26  ;;  %v99_v31 = vmul.f32 %v165_v27, %v93_v28 }
  0x9c   :  { %v78_v30 = vadd.f32 %v77_v24, %v67_v25 }
  0x9e   :  { %v89_v32 = vadd.f32 %v88_v29, %v78_v30 }
  0x9f   :  { %v104_v34 = vpop.permute.xlu1 %103 }
  0xa0   :  { %v100_v35 = vadd.f32 %v99_v31, %v89_v32  ;;  %v110_v36 = vmul.f32 %v166_v33, %v104_v34 }
  0xa2   :  { %v111_v40 = vadd.f32 %v110_v36, %v100_v35 }
  0xa4   :  { %v115_v39 = vpop.permute.xlu1 %114 }
  0xa5   :  { %v121_v41 = vmul.f32 %v167_v37, %v115_v39 }
  0xa7   :  { %v122_v44 = vadd.f32 %v121_v41, %v111_v40 }
  0xa9   :  { %v127_v45 = vadd.f32 %v168_v43, %v122_v44  ;;  %v137_v46 = vadd.f32 %v135_v42, %v122_v44 }
  0xab   :  { %129 = vst.msk [vmem:[#allocation5] sm:$0x1] %vm128_vm0, %v127_v45 }
  0xac   :  { %139 = vst.msk [vmem:[#allocation5] sm:$0x2] %vm138_vm1, %v137_v46 }
  0xad   :  { %213 = shalt.err (!%p210_p9)
}
  0xae   :  { %s214_s1 = scalar_lea.hbm %s312_s3, 32 }
  0xaf   :  { %p215_p10 = scmp.ne.s32.totalorder %s312_s3, %s214_s1  ;;  %p218_p11 = scmp.lt.u32.totalorder %s214_s1, %s312_s3 }
  0xb1   :  { %p220_p12 = pnand %p218_p11, %p215_p10 }
  0xb3   :  { %223 = shalt.err (!%p220_p12)
}
  0xb4   :  { %149 = dma.vmem_to_hbm [thread:$0]  %s147_s17, 32, %s312_s3, [#allocation3]  }
  0xb5   :  { %226 = dma.done.wait [#allocation3], 32  }
  0xb6   :  { %227 = vsyncadd [#allocation3], 4294967264 }
  0xb7   :  { %153 = vsyncpa [#allocation3], 1 }
  0xb8   :  { %154 = vsyncpa [#allocation4], 1 }

</bundles_post_ra>
